<compile_context>
chip_gen: v6e
topology: v6e:2x2x1
jax: 0.10.0
libtpu: 0.0.40
codegen_flags: <defaults>
</compile_context>

<pallas_src>
import functools

import numpy as np
import jax
import jax.numpy as jnp
from jax.experimental import pallas as pl
from jax.experimental.pallas import tpu as pltpu


def _round_up(x: int, m: int) -> int:
    return ((x + m - 1) // m) * m


# -----------------------------------------------------------------------------
# Pallas kernel factory (cached): grid = (anchor blocks [parallel],
#                                          gallery blocks [arbitrary reduction])
# -----------------------------------------------------------------------------
@functools.lru_cache(maxsize=None)
def _get_constellation_call(na_pad: int, np_pad: int, dp: int, ta: int, tn: int):
    grid = (na_pad // ta, np_pad // tn)

    def kernel(aug_ref, pos_ref, clsT_ref, neg_ref, loss_ref, m_sc, l_sc, p_sc):
        # aug_ref : (ta, dp)  bf16   anchor (augmented) embeddings
        # pos_ref : (ta, dp)  bf16   sampled positive embedding per anchor
        # clsT_ref: (dp, tn)  bf16   gallery embeddings, transposed
        # neg_ref : (ta, tn)  bf16   1.0 where column is a sampled negative
        # loss_ref: (ta, 1)   f32    per-anchor log(sum exp(dist) + 1)
        # scratch : m_sc/l_sc/p_sc (ta, 1) f32  — online-LSE max / sum / pos-dot
        kv = pl.program_id(1)

        @pl.when(kv == 0)
        def _():
            # The "+1.0" term of the reference is treated as exp(0):
            #   running max starts at 0, running sum starts at 1.
            m_sc[...] = jnp.zeros_like(m_sc)
            l_sc[...] = jnp.ones_like(l_sc)
            p_sc[...] = jnp.sum(
                aug_ref[...].astype(jnp.float32) * pos_ref[...].astype(jnp.float32),
                axis=-1, keepdims=True)

        # Similarity block on the MXU: S[i, j] = <f_i_a, f_j>   (bf16 in, f32 acc)
        s = jnp.dot(aug_ref[...], clsT_ref[...], preferred_element_type=jnp.float32)
        dist = s - p_sc[...]                                   # neg_dist - pos_dist
        # Fused mask + exp with log-sum-exp stabilization (no inf*0 → NaN hazard).
        masked = jnp.where(neg_ref[...] > 0, dist, -jnp.inf)
        blk_max = jnp.max(masked, axis=-1, keepdims=True)
        m_new = jnp.maximum(m_sc[...], blk_max)                # m_new >= 0, finite
        p = jnp.exp(masked - m_new)                            # masked-out → exp(-inf)=0
        l_sc[...] = l_sc[...] * jnp.exp(m_sc[...] - m_new) + jnp.sum(
            p, axis=-1, keepdims=True)
        m_sc[...] = m_new

        @pl.when(kv == pl.num_programs(1) - 1)
        def _():
            # log(sum_k exp(dist_k) + 1) = m + log(l)
            loss_ref[...] = m_sc[...] + jnp.log(l_sc[...])

    return pl.pallas_call(
        kernel,
        out_shape=jax.ShapeDtypeStruct((na_pad, 1), jnp.float32),
        grid_spec=pltpu.PrefetchScalarGridSpec(
            num_scalar_prefetch=0,
            grid=grid,
            in_specs=[
                pl.BlockSpec((ta, dp), lambda i, k: (i, 0)),   # anchors
                pl.BlockSpec((ta, dp), lambda i, k: (i, 0)),   # positives
                pl.BlockSpec((dp, tn), lambda i, k: (0, k)),   # gallery^T
                pl.BlockSpec((ta, tn), lambda i, k: (i, k)),   # negative mask
            ],
            out_specs=pl.BlockSpec((ta, 1), lambda i, k: (i, 0)),
            scratch_shapes=[pltpu.VMEM((ta, 1), jnp.float32)] * 3,
        ),
        compiler_params=pltpu.CompilerParams(
            dimension_semantics=("parallel", "arbitrary"),
            vmem_limit_bytes=32 * 1024 * 1024,
        ),
    )


# -----------------------------------------------------------------------------
# Jitted device path: cast/pad/transpose, run the kernel, finish the tiny
# (N_aug,)-sized mean / clip / weight reduction in-graph.
# -----------------------------------------------------------------------------
@jax.jit
def _constellation_loss_jax(aug_emb, cls_emb, neg_mask_u8, pos_idx, valid,
                            loss_weight, max_loss):
    n_aug, d = aug_emb.shape
    n = cls_emb.shape[0]

    dp = _round_up(max(d, 1), 128)
    if n_aug <= 128:
        na_pad = _round_up(max(n_aug, 1), 8)
        ta = na_pad
    else:
        na_pad = _round_up(n_aug, 128)
        ta = 128
    if n <= 512:
        np_pad = _round_up(max(n, 1), 128)
        tn = np_pad
    else:
        np_pad = _round_up(n, 512)
        tn = 512

    aug_bf = aug_emb.astype(jnp.bfloat16)
    cls_bf = cls_emb.astype(jnp.bfloat16)
    pos_bf = jnp.take(cls_bf, pos_idx, axis=0)        # (n_aug, d) sampled positives
    neg_bf = neg_mask_u8.astype(jnp.bfloat16)

    aug_p = jnp.pad(aug_bf, ((0, na_pad - n_aug), (0, dp - d)))
    pos_p = jnp.pad(pos_bf, ((0, na_pad - n_aug), (0, dp - d)))
    clsT_p = jnp.pad(cls_bf.T, ((0, dp - d), (0, np_pad - n)))
    neg_p = jnp.pad(neg_bf, ((0, na_pad - n_aug), (0, np_pad - n)))
    valid_p = jnp.pad(valid, (0, na_pad - n_aug)).reshape(na_pad, 1)

    per_anchor = _get_constellation_call(na_pad, np_pad, dp, ta, tn)(
        aug_p, pos_p, clsT_p, neg_p)                  # (na_pad, 1) f32

    num = jnp.sum(per_anchor * valid_p)
    den = jnp.sum(valid_p)
    mean = num / jnp.maximum(den, 1.0)
    out = loss_weight * jnp.clip(mean, 0.0, max_loss)
    # Empty loss_list in the reference -> ones(1) * max_contrastive_loss
    return jnp.where(den > 0.0, out, max_loss.astype(jnp.float32))


# -----------------------------------------------------------------------------
# Host-side glue: label-driven positive / negative sampling (vectorized
# candidate construction + seeded numpy RNG for the actual draws).
# -----------------------------------------------------------------------------
def _build_selection(labels, aug_labels, true_aug_labels, K, seed=0):
    # TODO(synk): the PyTorch reference uses Python's *global* random state via
    # random.sample; here a fixed-seed numpy RNG is used for determinism.
    labels = np.asarray(labels)
    aug_labels = np.asarray(aug_labels)
    n, n_aug = labels.shape[0], aug_labels.shape[0]
    true_set = np.unique(np.asarray(list(true_aug_labels)))

    lab_in_true = np.isin(labels, true_set)                  # (N,)
    aug_in_true = np.isin(aug_labels, true_set)              # (N_aug,)
    same = aug_labels[:, None] == labels[None, :]            # (N_aug, N)
    neg_cand = (~same) & lab_in_true[None, :]                # candidate negatives

    rng = np.random.default_rng(seed)
    neg_mask = np.zeros((n_aug, n), dtype=np.uint8)
    pos_idx = np.zeros((n_aug,), dtype=np.int32)
    valid = np.zeros((n_aug,), dtype=np.float32)
    for i in range(n_aug):
        if not aug_in_true[i]:
            continue
        negs = np.nonzero(neg_cand[i])[0]
        poss = np.nonzero(same[i])[0]
        if negs.size and poss.size:
            sel_neg = rng.choice(negs, size=min(K, negs.size), replace=False)
            neg_mask[i, sel_neg] = 1
            pos_idx[i] = np.int32(rng.choice(poss))
            valid[i] = 1.0
    return neg_mask, pos_idx, valid


def constellation_loss_cls(label_targets_aug, aug_cls_score_pred, cls_score_pred,
                           bbox_target_labels, aug_bbox_target_labels,
                           K=4, max_contrastive_loss=1.0, loss_weight=1.0, seed=0):
    """JAX/Pallas equivalent of ConstellationLossCLS.forward."""
    true_aug_labels = []
    for per_img in label_targets_aug:
        true_aug_labels += list(np.asarray(per_img).tolist())

    neg_mask, pos_idx, valid = _build_selection(
        list(bbox_target_labels), list(aug_bbox_target_labels),
        true_aug_labels, K, seed=seed)

    return _constellation_loss_jax(
        jnp.asarray(aug_cls_score_pred, jnp.float32),
        jnp.asarray(cls_score_pred, jnp.float32),
        jnp.asarray(neg_mask),                   # uint8 mask (H2D is 1 B/elem)
        jnp.asarray(pos_idx, jnp.int32),
        jnp.asarray(valid, jnp.float32),
        jnp.float32(loss_weight),
        jnp.float32(max_contrastive_loss),
    )


# -----------------------------------------------------------------------------
# Pure-numpy reference (mirrors the PyTorch code given the same sampled picks)
# -----------------------------------------------------------------------------
def _reference(aug_emb, cls_emb, neg_mask, pos_idx, valid, loss_weight, max_loss):
    aug_emb = np.asarray(aug_emb, np.float32)
    cls_emb = np.asarray(cls_emb, np.float32)
    losses = []
    for i in range(aug_emb.shape[0]):
        if valid[i] > 0:
            negs = cls_emb[neg_mask[i] > 0]                   # (K', D)
            pos = cls_emb[pos_idx[i]]                         # (D,)
            dist = aug_emb[i] @ negs.T - aug_emb[i] @ pos
            losses.append(np.log(np.sum(np.exp(dist)) + 1.0))
    if losses:
        l = sum(losses) / len(losses)
        return float(loss_weight * np.clip(l, 0.0, max_loss))
    return float(max_loss)


if __name__ == "__main__":
    key = jax.random.PRNGKey(0)
    N, N_AUG, D = 16, 8, 32  # gallery preds, augmented preds, embed dim

    k1, k2 = jax.random.split(key)
    cls_score_pred = 0.3 * jax.random.normal(k1, (N, D), dtype=jnp.float32)
    aug_cls_score_pred = 0.3 * jax.random.normal(k2, (N_AUG, D), dtype=jnp.float32)

    # Deterministic synthetic labels (4 classes).
    labels = [0, 1, 2, 3] * 4                                 # bbox_targets[0]
    aug_labels = [0, 1, 2, 3, 0, 1, 2, 3]                     # aug_bbox_targets[0]
    label_targets_aug = [[0, 1], [2, 3]]                      # per-image aug labels

    loss = constellation_loss_cls(
        label_targets_aug, aug_cls_score_pred, cls_score_pred,
        labels, aug_labels, K=4, max_contrastive_loss=5.0, loss_weight=1.0, seed=0)
    loss = jax.block_until_ready(loss)

    # Reference with identical sampled picks and bf16-rounded matmul operands.
    true_aug = [l for per in label_targets_aug for l in per]
    nm, pi, vd = _build_selection(labels, aug_labels, true_aug, K=4, seed=0)
    to_bf = lambda x: np.asarray(jnp.asarray(x, jnp.bfloat16).astype(jnp.float32))
    ref = _reference(to_bf(aug_cls_score_pred), to_bf(cls_score_pred),
                     nm, pi, vd, loss_weight=1.0, max_loss=5.0)
    assert np.allclose(float(loss), ref, rtol=5e-3, atol=5e-3), (float(loss), ref)

    print("KERNEL_OK")
</pallas_src>

<mosaic_0001>
module attributes {stable_mosaic.version = 11 : i64} {
  func.func @kernel(%arg0: i32, %arg1: i32, %arg2: memref<8x128xbf16, #tpu.memory_space<vmem>>, %arg3: memref<8x128xbf16, #tpu.memory_space<vmem>>, %arg4: memref<128x128xbf16, #tpu.memory_space<vmem>>, %arg5: memref<8x128xbf16, #tpu.memory_space<vmem>>, %arg6: memref<8x1xf32, #tpu.memory_space<vmem>>, %arg7: memref<8x1xf32, #tpu.memory_space<vmem>>, %arg8: memref<8x1xf32, #tpu.memory_space<vmem>>, %arg9: memref<8x1xf32, #tpu.memory_space<vmem>>) attributes {dimension_semantics = [#tpu.dimension_semantics<parallel>, #tpu.dimension_semantics<arbitrary>], iteration_bounds = array<i64: 1, 1>, scalar_prefetch = 0 : i64, scratch_operands = 3 : i64, tpu.core_type = #tpu.core_type<tc>, window_params = [{transform_indices = @transform_0, window_bounds = array<i64: 8, 128>}, {transform_indices = @transform_1, window_bounds = array<i64: 8, 128>}, {transform_indices = @transform_2, window_bounds = array<i64: 128, 128>}, {transform_indices = @transform_3, window_bounds = array<i64: 8, 128>}, {transform_indices = @transform_4, window_bounds = array<i64: 8, 1>}]} {
    %c0_i32 = arith.constant 0 : i32
    %0 = arith.cmpi eq, %arg1, %c0_i32 : i32
    %1 = arith.extui %0 : i1 to i32
    %c0_i32_0 = arith.constant 0 : i32
    %2 = arith.cmpi ne, %1, %c0_i32_0 : i32
    scf.if %2 {
      %cst_24 = arith.constant 0.000000e+00 : f32
      %34 = vector.broadcast %cst_24 : f32 to vector<8x1xf32>
      %c0_25 = arith.constant 0 : index
      %c0_26 = arith.constant 0 : index
      %35 = vector.load %arg7[%c0_25, %c0_26] : memref<8x1xf32, #tpu.memory_space<vmem>>, vector<8x1xf32>
      tpu.vector_store %arg7[%c0_25, %c0_26], %34 {strides = array<i32>} : memref<8x1xf32, #tpu.memory_space<vmem>>, vector<8x1xf32>,
      %cst_27 = arith.constant 1.000000e+00 : f32
      %36 = vector.broadcast %cst_27 : f32 to vector<8x1xf32>
      %c0_28 = arith.constant 0 : index
      %c0_29 = arith.constant 0 : index
      %37 = vector.load %arg8[%c0_28, %c0_29] : memref<8x1xf32, #tpu.memory_space<vmem>>, vector<8x1xf32>
      tpu.vector_store %arg8[%c0_28, %c0_29], %36 {strides = array<i32>} : memref<8x1xf32, #tpu.memory_space<vmem>>, vector<8x1xf32>,
      %c0_30 = arith.constant 0 : index
      %c0_31 = arith.constant 0 : index
      %38 = vector.load %arg2[%c0_30, %c0_31] : memref<8x128xbf16, #tpu.memory_space<vmem>>, vector<8x128xbf16>
      %39 = arith.extf %38 : vector<8x128xbf16> to vector<8x128xf32>
      %c0_32 = arith.constant 0 : index
      %c0_33 = arith.constant 0 : index
      %40 = vector.load %arg3[%c0_32, %c0_33] : memref<8x128xbf16, #tpu.memory_space<vmem>>, vector<8x128xbf16>
      %41 = arith.extf %40 : vector<8x128xbf16> to vector<8x128xf32>
      %42 = arith.mulf %39, %41 : vector<8x128xf32>
      %cst_34 = arith.constant dense<0.000000e+00> : vector<8xf32>
      %43 = vector.multi_reduction <add>, %42, %cst_34 [1] : vector<8x128xf32> to vector<8xf32>
      %44 = vector.shape_cast %43 : vector<8xf32> to vector<8x1xf32>
      %c0_35 = arith.constant 0 : index
      %c0_36 = arith.constant 0 : index
      %45 = vector.load %arg9[%c0_35, %c0_36] : memref<8x1xf32, #tpu.memory_space<vmem>>, vector<8x1xf32>
      tpu.vector_store %arg9[%c0_35, %c0_36], %44 {strides = array<i32>} : memref<8x1xf32, #tpu.memory_space<vmem>>, vector<8x1xf32>,
    } else {
    }
    %c0 = arith.constant 0 : index
    %c0_1 = arith.constant 0 : index
    %3 = vector.load %arg2[%c0, %c0_1] : memref<8x128xbf16, #tpu.memory_space<vmem>>, vector<8x128xbf16>
    %c0_2 = arith.constant 0 : index
    %c0_3 = arith.constant 0 : index
    %4 = vector.load %arg4[%c0_2, %c0_3] : memref<128x128xbf16, #tpu.memory_space<vmem>>, vector<128x128xbf16>
    %cst = arith.constant dense<0.000000e+00> : vector<8x128xf32>
    %5 = tpu.matmul %3, %4, %cst {dimension_numbers = #tpu.dot_dimension_numbers<[1], [0], [0], [1], [0, 0, 1, 1], [], []>} : vector<8x128xbf16>, vector<128x128xbf16>, vector<8x128xf32> -> vector<8x128xf32>
    %c0_4 = arith.constant 0 : index
    %c0_5 = arith.constant 0 : index
    %6 = vector.load %arg9[%c0_4, %c0_5] : memref<8x1xf32, #tpu.memory_space<vmem>>, vector<8x1xf32>
    %7 = vector.broadcast %6 : vector<8x1xf32> to vector<8x128xf32>
    %8 = arith.subf %5, %7 : vector<8x128xf32>
    %c0_6 = arith.constant 0 : index
    %c0_7 = arith.constant 0 : index
    %9 = vector.load %arg5[%c0_6, %c0_7] : memref<8x128xbf16, #tpu.memory_space<vmem>>, vector<8x128xbf16>
    %cst_8 = arith.constant 0.000000e+00 : bf16
    %10 = vector.broadcast %cst_8 : bf16 to vector<8x128xbf16>
    %11 = arith.cmpf ogt, %9, %10 : vector<8x128xbf16>
    %cst_9 = arith.constant 0xFF800000 : f32
    %12 = vector.broadcast %cst_9 : f32 to vector<8x128xf32>
    %13 = arith.select %11, %8, %12 : vector<8x128xi1>, vector<8x128xf32>
    %cst_10 = arith.constant dense<0xFF800000> : vector<8xf32>
    %14 = vector.multi_reduction <maximumf>, %13, %cst_10 [1] : vector<8x128xf32> to vector<8xf32>
    %15 = vector.shape_cast %14 : vector<8xf32> to vector<8x1xf32>
    %c0_11 = arith.constant 0 : index
    %c0_12 = arith.constant 0 : index
    %16 = vector.load %arg7[%c0_11, %c0_12] : memref<8x1xf32, #tpu.memory_space<vmem>>, vector<8x1xf32>
    %17 = arith.maximumf %16, %15 : vector<8x1xf32>
    %18 = vector.broadcast %17 : vector<8x1xf32> to vector<8x128xf32>
    %19 = arith.subf %13, %18 : vector<8x128xf32>
    %20 = math.exp %19 : vector<8x128xf32>
    %c0_13 = arith.constant 0 : index
    %c0_14 = arith.constant 0 : index
    %21 = vector.load %arg8[%c0_13, %c0_14] : memref<8x1xf32, #tpu.memory_space<vmem>>, vector<8x1xf32>
    %c0_15 = arith.constant 0 : index
    %c0_16 = arith.constant 0 : index
    %22 = vector.load %arg7[%c0_15, %c0_16] : memref<8x1xf32, #tpu.memory_space<vmem>>, vector<8x1xf32>
    %23 = arith.subf %22, %17 : vector<8x1xf32>
    %24 = math.exp %23 : vector<8x1xf32>
    %25 = arith.mulf %21, %24 : vector<8x1xf32>
    %cst_17 = arith.constant dense<0.000000e+00> : vector<8xf32>
    %26 = vector.multi_reduction <add>, %20, %cst_17 [1] : vector<8x128xf32> to vector<8xf32>
    %27 = vector.shape_cast %26 : vector<8xf32> to vector<8x1xf32>
    %28 = arith.addf %25, %27 : vector<8x1xf32>
    %c0_18 = arith.constant 0 : index
    %c0_19 = arith.constant 0 : index
    %29 = vector.load %arg8[%c0_18, %c0_19] : memref<8x1xf32, #tpu.memory_space<vmem>>, vector<8x1xf32>
    tpu.vector_store %arg8[%c0_18, %c0_19], %28 {strides = array<i32>} : memref<8x1xf32, #tpu.memory_space<vmem>>, vector<8x1xf32>,
    %c0_20 = arith.constant 0 : index
    %c0_21 = arith.constant 0 : index
    %30 = vector.load %arg7[%c0_20, %c0_21] : memref<8x1xf32, #tpu.memory_space<vmem>>, vector<8x1xf32>
    tpu.vector_store %arg7[%c0_20, %c0_21], %17 {strides = array<i32>} : memref<8x1xf32, #tpu.memory_space<vmem>>, vector<8x1xf32>,
    %c0_i32_22 = arith.constant 0 : i32
    %31 = arith.cmpi eq, %arg1, %c0_i32_22 : i32
    %32 = arith.extui %31 : i1 to i32
    %c0_i32_23 = arith.constant 0 : i32
    %33 = arith.cmpi ne, %32, %c0_i32_23 : i32
    scf.if %33 {
      %c0_24 = arith.constant 0 : index
      %c0_25 = arith.constant 0 : index
      %34 = vector.load %arg7[%c0_24, %c0_25] : memref<8x1xf32, #tpu.memory_space<vmem>>, vector<8x1xf32>
      %c0_26 = arith.constant 0 : index
      %c0_27 = arith.constant 0 : index
      %35 = vector.load %arg8[%c0_26, %c0_27] : memref<8x1xf32, #tpu.memory_space<vmem>>, vector<8x1xf32>
      %36 = math.log %35 : vector<8x1xf32>
      %37 = arith.addf %34, %36 : vector<8x1xf32>
      %c0_28 = arith.constant 0 : index
      %c0_29 = arith.constant 0 : index
      %38 = vector.load %arg6[%c0_28, %c0_29] : memref<8x1xf32, #tpu.memory_space<vmem>>, vector<8x1xf32>
      tpu.vector_store %arg6[%c0_28, %c0_29], %37 {strides = array<i32>} : memref<8x1xf32, #tpu.memory_space<vmem>>, vector<8x1xf32>,
    } else {
    }
    return
  }
  func.func @transform_0(%arg0: i32, %arg1: i32) -> (i32, i32) {
    %c0_i32 = arith.constant 0 : i32
    %c0_i32_0 = arith.constant 0 : i32
    return %arg0, %c0_i32 : i32, i32
  }
  func.func @transform_1(%arg0: i32, %arg1: i32) -> (i32, i32) {
    %c0_i32 = arith.constant 0 : i32
    %c0_i32_0 = arith.constant 0 : i32
    return %arg0, %c0_i32 : i32, i32
  }
  func.func @transform_2(%arg0: i32, %arg1: i32) -> (i32, i32) {
    %c0_i32 = arith.constant 0 : i32
    %c0_i32_0 = arith.constant 0 : i32
    return %c0_i32, %arg1 : i32, i32
  }
  func.func @transform_3(%arg0: i32, %arg1: i32) -> (i32, i32) {
    %c0_i32 = arith.constant 0 : i32
    return %arg0, %arg1 : i32, i32
  }
  func.func @transform_4(%arg0: i32, %arg1: i32) -> (i32, i32) {
    %c0_i32 = arith.constant 0 : i32
    %c0_i32_0 = arith.constant 0 : i32
    return %arg0, %c0_i32 : i32, i32
  }
}

</mosaic_0001>

<bundles_post_ra>
// kernel: _constellation_loss_jax.1
= control target key start
LH: loop header
LB: loop body
LE: loop exit
PB: predicated region body
PF: predicated region fallthrough
CT: control target
= control target key end

     0   :  { %vm24_vm0 = vcmask 7168   ;;  %v246_v2 = vmov 0.0   ;;  %vm247_vm1 = vmmov 0   ;;  %v248_v11 = vmov 0   ;;  %s320_s0 = inlined_call_operand.vmem [shape: bf16[8,128], index: 0, kind: input, shape index: {}]   ;;  %s321_s1 = inlined_call_operand.vmem [shape: bf16[8,128], index: 1, kind: input, shape index: {}]   ;;  %s322_s2 = inlined_call_operand.vmem [shape: bf16[128,128], index: 2, kind: input, shape index: {}]   ;;  %s323_s3 = inlined_call_operand.vmem [shape: bf16[8,128], index: 3, kind: input, shape index: {}]   ;;  %s324_s4 = inlined_call_operand.vmem [shape: f32[8,1], index: 4, kind: output, shape index: {}]  }
   0x1   :  { %v27_v0 = vld [vmem:[%s320_s0] sm:$0xf]  ;;  %206 = vmatprep.subr.bf16.mxu0 %v246_v2  ;;  %222 = vmatprep.mubr.msk.bf16.mxu0 %vm247_vm1, %v246_v2  ;;  %25 = vst.msk [vmem:[#allocation2] sm:$0xff] %vm24_vm0, %v246_v2  ;;  %v232_v5 = vld [vmem:[%s322_s2 + $0x38] sm:$0xff]   ;;  %v233_v7 = vld [vmem:[%s322_s2 + $0x30] sm:$0xff]   ;;  %v249_v28 = vmov 1.0  }
   0x2   :  { %v29_v1 = vld [vmem:[%s321_s1] sm:$0xf]  ;;  %v28_v3 = vunpack.c.l.bf16 %v27_v0  ;;  %207 = vmatpush3.bf16.msra.mxu0 %v232_v5  ;;  %v234_v8 = vld [vmem:[%s322_s2 + $0x28] sm:$0xff]   ;;  %v236_v10 = vld [vmem:[%s322_s2 + $0x18] sm:$0xff]   ;;  %230 = vset.pattern.permute.xlu0 %v248_v11  ;;  %26 = vst.msk [vmem:[#allocation3] sm:$0xff] %vm24_vm0, %v249_v28 }
   0x3   :  { %v30_v4 = vunpack.c.l.bf16 %v29_v1  ;;  %208 = vmatprep.subr.bf16.mxu0 %v246_v2  ;;  %v235_v9 = vld [vmem:[%s322_s2 + $0x20] sm:$0xff]   ;;  %231 = vset.pattern.permute.xlu1 %v248_v11  ;;  %v237_v12 = vld [vmem:[%s322_s2 + $0x10] sm:$0xff]   ;;  %v238_v13 = vld [vmem:[%s322_s2 + $0x8] sm:$0xff]  }
   0x4   :  { %v239_v14 = vld [vmem:[%s322_s2] sm:$0xff]  }
   0x5   :  { %v31_v6 = vmul.f32 %v30_v4, %v28_v3  ;;  %v35_v15 = vld [vmem:[%s320_s0] sm:$0xf] }
   0x6   :  { %209 = vmatpush3.bf16.msra.mxu0 %v233_v7  ;;  %v147_v22 = vld [vmem:[%s323_s3] sm:$0xf] }
   0x7   :  { %32 = vadd.xlane.f32.xlu0 %v31_v6  ;;  %210 = vmatprep.subr.bf16.mxu0 %v246_v2  ;;  %vm148_vm2 = vcmp.gt.bf16.partialorder %v147_v22, 0 }
   0x8   :  { %v149_v23 = vsel %vm148_vm2, 65537, %v248_v11  ;;  %v155_v29 = vld [vmem:[#allocation2] sm:$0xff] }
   0x9   :  { %v150_v24 = vunpack.c.l.b16 %v149_v23  ;;  %v165_v39 = vld [vmem:[#allocation3] sm:$0xff] }
   0xa   :  { %211 = vmatpush3.bf16.msra.mxu0 %v234_v8 }
   0xb   :  { %212 = vmatprep.subr.bf16.mxu0 %v246_v2  ;;  %vm151_vm3 = vcmp.ne.s32.totalorder %v150_v24, 0 }
   0xe   :  { %213 = vmatpush3.bf16.msra.mxu0 %v235_v9 }
   0xf   :  { %214 = vmatprep.subr.bf16.mxu0 %v246_v2 }
  0x12   :  { %215 = vmatpush3.bf16.msra.mxu0 %v236_v10 }
  0x13   :  { %216 = vmatprep.subr.bf16.mxu0 %v246_v2 }
  0x16   :  { %217 = vmatpush3.bf16.msra.mxu0 %v237_v12 }
  0x17   :  { %218 = vmatprep.subr.bf16.mxu0 %v246_v2 }
  0x1a   :  { %219 = vmatpush3.bf16.msra.mxu0 %v238_v13 }
  0x1b   :  { %220 = vmatprep.subr.bf16.mxu0 %v246_v2 }
  0x1e   :  { %221 = vmatpush3.bf16.msra.mxu0 %v239_v14 }
  0x21   :  { %223 = vmatmul.mubr.bf16.vlgmr.msra.gmra.mxu0 %v35_v15 }
  0x90   :  { %v33_v16 = vpop.xlane.xlu0 %32 }
  0x91   :  { %34 = vst.msk [vmem:[#allocation4] sm:$0xff] %vm24_vm0, %v33_v16 }
  0x98   :  { %v140_v17 = vld [vmem:[#allocation4] sm:$0xff] }
  0x99   :  { %143 = vperm.xlu0 %230, %v140_v17  }
  0xe1   :  { %v134_v18 = vpop.f32.mrf.mxu0 }
  0xe3   :  { %v224_v19 = vpop.f32.mrf.mxu0 }
  0xe5   :  { %v137_v20 = vpop.f32.mrf.mxu0 }
  0xe7   :  { %v225_v21 = vpop.f32.mrf.mxu0 }
 0x114   :  { %v144_v25 = vpop.permute.xlu0 %143 }
 0x115   :  { %v146_v26 = vsub.f32 %v134_v18, %v144_v25 }
 0x117   :  { %v152_v27 = vsel %vm151_vm3, %v146_v26, -inf }
 0x118   :  { %153 = vmax.xlane.f32.xlu1 %v152_v27 }
 0x1a1   :  { %v154_v30 = vpop.xlane.xlu1 %153 }
 0x1a2   :  { %v156_v31 = vmax.f32 %v155_v29, %v154_v30 }
 0x1a4   :  { %v166_v32 = vsub.f32 %v155_v29, %v156_v31  ;;  %175 = vst.msk [vmem:[#allocation2] sm:$0xff] %vm24_vm0, %v156_v31  ;;  %159 = vperm.xlu1 %231, %v156_v31  }
 0x1a6   :  { %v167_v37 = vmul.f32 1.442695, %v166_v32 }
 0x1ab   :  { %v179_v46 = vld [vmem:[#allocation2] sm:$0xff] }
 0x21f   :  { %v160_v33 = vpop.permute.xlu1 %159 }
 0x220   :  { %v162_v34 = vsub.f32 %v152_v27, %v160_v33 }
 0x222   :  { %v163_v35 = vmul.f32 1.442695, %v162_v34 }
 0x224   :  { %240 = vpow2.f32 %v163_v35 }
 0x225   :  { %242 = vpow2.f32 %v167_v37 }
 0x231   :  { %v241_v36 = vpop.eup %240 }
 0x232   :  { %170 = vadd.xlane.f32.xlu1 %v241_v36  ;;  %v243_v38 = vpop.eup %242 }
 0x233   :  { %v169_v40 = vmul.f32 %v243_v38, %v165_v39 }
 0x2bb   :  { %v171_v41 = vpop.xlane.xlu1 %170 }
 0x2bc   :  { %v172_v42 = vadd.f32 %v171_v41, %v169_v40 }
 0x2be   :  { %174 = vst.msk [vmem:[#allocation3] sm:$0xff] %vm24_vm0, %v172_v42 }
 0x2c5   :  { %v180_v43 = vld [vmem:[#allocation3] sm:$0xff] }
 0x2c6   :  { %244 = vlog2.f32 %v180_v43 }
 0x2d3   :  { %v245_v44 = vpop.eup %244 }
 0x2d4   :  { %v182_v45 = vmul.f32 0.6931472, %v245_v44 }
 0x2d6   :  { %v183_v47 = vadd.f32 %v182_v45, %v179_v46 }
 0x2d8   :  { %184 = vst.msk [vmem:[%s324_s4] sm:$0xff] %vm24_vm0, %v183_v47 }

</bundles_post_ra>
